<compile_context>
chip_gen: v7x
topology: tpu7x:2x2x1
jax: 0.10.0
libtpu: 0.0.40
codegen_flags: <defaults>
</compile_context>

<pallas_src>
import jax
import jax.numpy as jnp
from jax.experimental import pallas as pl
from jax.experimental.pallas import tpu as pltpu


def _round_up(x, m):
    return ((x + m - 1) // m) * m


def _make_sse_kernel(use_vpu_contraction):
    def kernel(w_ref, b_ref, x_ref, o_ref):
        # w_ref: (C,) f32 SMEM  (VPU path)  or  (1, C) f32 VMEM (MXU path)
        # b_ref: (1,)  f32 SMEM
        # x_ref: (1, C, TS) input tile      o_ref: (1, C, TS) output tile
        x = x_ref[0]                                  # (C, TS), native dtype
        C, TS = x.shape

        if use_vpu_contraction:
            # Small C: unrolled per-channel scalar-broadcast MAC on the VPU.
            # Avoids an M=1 MXU matmul (wastes the systolic array + MRF path).
            z = jnp.full((1, TS), b_ref[0], dtype=jnp.float32)
            for c in range(C):
                z = z + w_ref[c] * x[c:c + 1, :].astype(jnp.float32)
        else:
            # Larger C: channel contraction on the MXU with f32 accumulation.
            z = jnp.dot(w_ref[...].astype(x.dtype), x,
                        preferred_element_type=jnp.float32) + b_ref[0]

        # sigmoid(z) = 1 / (1 + exp(-z)): exp + reciprocal land in the EUP
        # slot, keeping the VALU free for the gating multiply below.
        gate = pl.reciprocal(1.0 + jnp.exp(-z), approx=False)   # (1, TS) f32

        # Broadcast multiply in the input dtype: only the gate row is cast.
        o_ref[0] = x * gate.astype(x.dtype)

    return kernel


def spatial_se_layer(x_ncdhw, weight, bias, *,
                     pipelined_vmem_budget_bytes=20 * 1024 * 1024,
                     vmem_limit_bytes=40 * 1024 * 1024):
    """x_ncdhw: (B, C, D, H, W); weight: (1, C, 1, 1, 1); bias: (1,)."""
    B, C, D, H, W = x_ncdhw.shape
    S = D * H * W
    dtype = x_ncdhw.dtype
    itemsize = jnp.dtype(dtype).itemsize

    # A (1, C, TS) VMEM block stores C on the sublane axis, padded to
    # 8 (f32) / 16 (bf16) / 32 (int8) rows — account for it when sizing tiles.
    sublane = max(8, 32 // itemsize)
    c_pad = _round_up(C, sublane)

    # Largest lane-dense spatial tile whose pipelined buffers
    # (2 double-buffered input tiles + 2 output tiles) fit the budget.
    cap = pipelined_vmem_budget_bytes // (2 * 2 * c_pad * itemsize)
    cap = max(128, (cap // 128) * 128)
    tile_s = min(cap, _round_up(S, 128))

    # Guarantee >= 2 grid steps so v7x's two TensorCores both get work
    # (no-op on v5e/v6e, harmless when S is tiny).
    if B * pl.cdiv(S, tile_s) < 2 and S > 128:
        tile_s = min(tile_s, _round_up(pl.cdiv(S, 2), 128))

    grid = (B, pl.cdiv(S, tile_s))   # partial last block masked by Pallas

    x = x_ncdhw.reshape(B, C, S)
    b1d = bias.reshape(1).astype(jnp.float32)

    use_vpu = C <= 32
    if use_vpu:
        # Tiny weight vector lives in SMEM: cheap scalar reads, no pipeline buffer.
        w_arg = weight.reshape(C).astype(jnp.float32)
        w_spec = pl.BlockSpec(memory_space=pltpu.MemorySpace.SMEM)
    else:
        # Constant-index VMEM block feeding the MXU path.
        w_arg = weight.reshape(1, C).astype(jnp.float32)
        w_spec = pl.BlockSpec((1, C), lambda b, s: (0, 0))

    cost = pl.CostEstimate(
        flops=3 * B * C * S,                    # 2*C MAC + 1 gating mul per voxel-channel
        transcendentals=B * S,                  # one exp per voxel
        bytes_accessed=2 * B * C * S * itemsize)  # read x + write out

    out = pl.pallas_call(
        _make_sse_kernel(use_vpu),
        out_shape=jax.ShapeDtypeStruct((B, C, S), dtype),
        grid_spec=pltpu.PrefetchScalarGridSpec(
            num_scalar_prefetch=0,
            grid=grid,
            in_specs=[
                w_spec,
                # bias: scalar in SMEM, no pipeline buffer.
                pl.BlockSpec(memory_space=pltpu.MemorySpace.SMEM),
                # x: lane-dense spatial tile (last block masked if S % tile_s != 0).
                pl.BlockSpec((1, C, tile_s), lambda b, s: (b, 0, s)),
            ],
            out_specs=pl.BlockSpec((1, C, tile_s), lambda b, s: (b, 0, s)),
        ),
        compiler_params=pltpu.CompilerParams(
            # Both axes independent -> megacore sharding on v7x (2 TCs);
            # no-op on v5e/v6e.
            dimension_semantics=("parallel", "parallel"),
            # 40 MiB leaves headroom inside v7x's 64 MiB physical VMEM
            # (weight buffers + compiler internal scratch); comfortable on
            # v5e/v6e where DMA is already multi-microsecond per step.
            vmem_limit_bytes=vmem_limit_bytes,
        ),
        cost_estimate=cost,
        # Optional sweep on v7x: pipeline_mode=pl.Buffered(3) on the x spec
        # (shrink tile_s accordingly); expected single-digit % only.
    )(w_arg, b1d, x)

    return out.reshape(B, C, D, H, W)


if __name__ == "__main__":
    key = jax.random.PRNGKey(0)
    kx, kw, kb = jax.random.split(key, 3)

    # Small NCDHW input consistent with Conv3d: batch=2, channels=4, D=4, H=8, W=8
    B, C, D, H, W = 2, 4, 4, 8, 8
    x = jax.random.normal(kx, (B, C, D, H, W), dtype=jnp.float32)

    # Deterministic synthetic Conv3d(num_channels -> 1, kernel_size=1) params.
    fan_in = C  # C * 1 * 1 * 1
    bound = 1.0 / jnp.sqrt(fan_in)
    weight = jax.random.uniform(kw, (1, C, 1, 1, 1), minval=-bound, maxval=bound,
                                dtype=jnp.float32)
    bias = jax.random.uniform(kb, (1,), minval=-bound, maxval=bound,
                              dtype=jnp.float32)

    out = spatial_se_layer(x, weight, bias)
    out = jax.block_until_ready(out)

    # Reference (plain JAX) check of the same math.
    mid_ref = jax.nn.sigmoid(
        jnp.einsum("bcdhw,c->bdhw", x, weight.reshape(C)) + bias[0])
    ref = x * mid_ref[:, None, :, :, :]
    assert jnp.allclose(out, ref, atol=1e-5, rtol=1e-5)

    print("KERNEL_OK")
</pallas_src>

<mosaic_0001>
module attributes {stable_mosaic.version = 11 : i64} {
  func.func @kernel(%arg0: i32, %arg1: i32, %arg2: memref<4xf32, #tpu.memory_space<smem>>, %arg3: memref<1xf32, #tpu.memory_space<smem>>, %arg4: memref<1x4x256xf32, #tpu.memory_space<vmem>>, %arg5: memref<1x4x256xf32, #tpu.memory_space<vmem>>) attributes {dimension_semantics = [#tpu.dimension_semantics<parallel>, #tpu.dimension_semantics<parallel>], iteration_bounds = array<i64: 2, 1>, scalar_prefetch = 0 : i64, scratch_operands = 0 : i64, tpu.core_type = #tpu.core_type<tc>, window_params = [{transform_indices = @transform_0, window_bounds = array<i64: 4>}, {transform_indices = @transform_1, window_bounds = array<i64: 1>}, {transform_indices = @transform_2, window_bounds = array<i64: 1, 4, 256>}, {transform_indices = @transform_3, window_bounds = array<i64: 1, 4, 256>}]} {
    %c0 = arith.constant 0 : index
    %c0_0 = arith.constant 0 : index
    %c0_1 = arith.constant 0 : index
    %0 = vector.load %arg4[%c0, %c0_0, %c0_1] : memref<1x4x256xf32, #tpu.memory_space<vmem>>, vector<1x4x256xf32>
    %1 = vector.shape_cast %0 : vector<1x4x256xf32> to vector<4x256xf32>
    %c0_2 = arith.constant 0 : index
    %2 = memref.load %arg3[%c0_2] : memref<1xf32, #tpu.memory_space<smem>>
    %3 = vector.broadcast %2 : f32 to vector<1x256xf32>
    %c0_3 = arith.constant 0 : index
    %4 = memref.load %arg2[%c0_3] : memref<4xf32, #tpu.memory_space<smem>>
    %5 = vector.extract_strided_slice %1 {offsets = [0, 0], sizes = [1, 256], strides = [1, 1]} : vector<4x256xf32> to vector<1x256xf32>
    %6 = vector.broadcast %4 : f32 to vector<1x256xf32>
    %7 = arith.mulf %6, %5 : vector<1x256xf32>
    %8 = arith.addf %3, %7 : vector<1x256xf32>
    %c1 = arith.constant 1 : index
    %9 = memref.load %arg2[%c1] : memref<4xf32, #tpu.memory_space<smem>>
    %10 = vector.extract_strided_slice %1 {offsets = [1, 0], sizes = [1, 256], strides = [1, 1]} : vector<4x256xf32> to vector<1x256xf32>
    %11 = vector.broadcast %9 : f32 to vector<1x256xf32>
    %12 = arith.mulf %11, %10 : vector<1x256xf32>
    %13 = arith.addf %8, %12 : vector<1x256xf32>
    %c2 = arith.constant 2 : index
    %14 = memref.load %arg2[%c2] : memref<4xf32, #tpu.memory_space<smem>>
    %15 = vector.extract_strided_slice %1 {offsets = [2, 0], sizes = [1, 256], strides = [1, 1]} : vector<4x256xf32> to vector<1x256xf32>
    %16 = vector.broadcast %14 : f32 to vector<1x256xf32>
    %17 = arith.mulf %16, %15 : vector<1x256xf32>
    %18 = arith.addf %13, %17 : vector<1x256xf32>
    %c3 = arith.constant 3 : index
    %19 = memref.load %arg2[%c3] : memref<4xf32, #tpu.memory_space<smem>>
    %20 = vector.extract_strided_slice %1 {offsets = [3, 0], sizes = [1, 256], strides = [1, 1]} : vector<4x256xf32> to vector<1x256xf32>
    %21 = vector.broadcast %19 : f32 to vector<1x256xf32>
    %22 = arith.mulf %21, %20 : vector<1x256xf32>
    %23 = arith.addf %18, %22 : vector<1x256xf32>
    %cst = arith.constant 0.000000e+00 : f32
    %24 = vector.broadcast %cst : f32 to vector<1x256xf32>
    %25 = arith.subf %24, %23 : vector<1x256xf32>
    %26 = math.exp %25 : vector<1x256xf32>
    %cst_4 = arith.constant 1.000000e+00 : f32
    %27 = vector.broadcast %cst_4 : f32 to vector<1x256xf32>
    %28 = arith.addf %27, %26 : vector<1x256xf32>
    %29 = tpu.reciprocal %28 : vector<1x256xf32> -> vector<1x256xf32>
    %30 = vector.broadcast %29 : vector<1x256xf32> to vector<4x256xf32>
    %31 = arith.mulf %1, %30 : vector<4x256xf32>
    %c0_5 = arith.constant 0 : index
    %c0_6 = arith.constant 0 : index
    %c0_7 = arith.constant 0 : index
    %32 = vector.load %arg5[%c0_5, %c0_6, %c0_7] : memref<1x4x256xf32, #tpu.memory_space<vmem>>, vector<1x4x256xf32>
    %33 = vector.shape_cast %32 : vector<1x4x256xf32> to vector<4x256xf32>
    %34 = vector.shape_cast %31 : vector<4x256xf32> to vector<1x4x256xf32>
    tpu.vector_store %arg5[%c0_5, %c0_6, %c0_7], %34 {strides = array<i32>} : memref<1x4x256xf32, #tpu.memory_space<vmem>>, vector<1x4x256xf32>,
    return
  }
  func.func @transform_0(%arg0: i32, %arg1: i32) -> i32 {
    %c0_i32 = arith.constant 0 : i32
    %c0_i32_0 = arith.constant 0 : i32
    return %c0_i32 : i32
  }
  func.func @transform_1(%arg0: i32, %arg1: i32) -> i32 {
    %c0_i32 = arith.constant 0 : i32
    %c0_i32_0 = arith.constant 0 : i32
    return %c0_i32 : i32
  }
  func.func @transform_2(%arg0: i32, %arg1: i32) -> (i32, i32, i32) {
    %c0_i32 = arith.constant 0 : i32
    %c0_i32_0 = arith.constant 0 : i32
    return %arg0, %c0_i32, %arg1 : i32, i32, i32
  }
  func.func @transform_3(%arg0: i32, %arg1: i32) -> (i32, i32, i32) {
    %c0_i32 = arith.constant 0 : i32
    %c0_i32_0 = arith.constant 0 : i32
    return %arg0, %c0_i32, %arg1 : i32, i32, i32
  }
}

</mosaic_0001>

<bundles_post_ra>
// kernel: tpu_custom_call.1
= control target key start
LH: loop header
LB: loop body
LE: loop exit
PB: predicated region body
PF: predicated region fallthrough
CT: control target
= control target key end

     0   :  { %s860_s0 = inlined_call_operand.vmem [shape: f32[4], index: 0, kind: input, shape index: {}]   ;;  %s861_s1 = inlined_call_operand.<no memory space> [shape: f32[1], index: 1, kind: input, shape index: {}]   ;;  %s862_s2 = inlined_call_operand.hbm [shape: f32[2,4,256], index: 2, kind: input, shape index: {}]   ;;  %s863_s3 = inlined_call_operand.hbm [shape: f32[2,4,256], index: 3, kind: output, shape index: {}]  }
   0x1   :  { %8 = sst [smem:[#allocation2]] %s861_s1 }
   0x2   :  { %9 = vsyncpa [#allocation6], 0 }
   0x3   :  { %10 = vsyncpa [#allocation4], 0 }
   0x4   :  { %12 = vsyncpa [#allocation4 + $0x1], 0 }
   0x5   :  { %13 = vsyncpa [#allocation5], 0 }
   0x6   :  { %15 = vsyncpa [#allocation5 + $0x1], 0  ;;  %s657_s14 = smov 0   ;;  %s659_s15 = smov 0  }
   0x7   :  { %s661_s16 = smov 0   ;;  %s663_s17 = smov 0  }
   0x8   :  { %s665_s18 = smov 0   ;;  %s667_s19 = smov 0  }
   0x9 LB: > { %s396_s1 = sadd.s32 4294967295, %s629_s19   ;;  %s397_s20 = sadd.s32 4294967294, %s629_s19   ;;  %s629_s19 = sphi %s667_s19, %s21_s19   ;;  %s625_s18 = sphi %s665_s18, %s885_s18   ;;  %s621_s17 = sphi %s663_s17, %s884_s17   ;;  %s617_s16 = sphi %s661_s16, %s883_s16   ;;  %s613_s15 = sphi %s659_s15, %s882_s15   ;;  %s609_s14 = sphi %s657_s14, %s881_s14  }
   0xa   : > { %p97_p0 = scmp.ne.s32.totalorder %s613_s15, %s609_s14  ;;  %p691_p1 = scmp.eq.s32.totalorder %s396_s1, 0 }
   0xb   : > { %p695_p2 = scmp.eq.s32.totalorder %s396_s1, 1  ;;  %p129_p3 = scmp.eq.s32.totalorder %s397_s20, 1 }
   0xc   : > { %s868_s21 = scalar_select %p691_p1, 1, 0 }
   0xd   : > { %p701_p4 = por %p691_p1, %p97_p0  ;;  %p398_p5 = scmp.ge.s32.totalorder %s629_s19, 1 }
   0xe   : > { %p706_p6 = por %p129_p3, %p97_p0  ;;  %p136_p7 = scmp.lt.s32.totalorder %s629_s19, 3 }
   0xf   : > { %s870_s23 = scalar_select %p701_p4, 1, 0 }
  0x10   : > { %s871_s24 = scalar_select %p706_p6, 1, 0 }
  0x11   : > { %s149_s27 = sshll.u32 %s860_s0, 4  ;;  %p714_p8 = pnand %p398_p5, %p136_p7  ;;  %s150_s27 = int_to_ptr.vmem [resolvable:$true] %s149_s27 }
  0x12   : > { %s33_s30 = sadd.s32 1, %s625_s18  ;;  %s84_s4 = sadd.s32 1, %s617_s16 }
  0x13   : > { %p429_p10 = pneg %p714_p8  ;;  %p35_p12 = scmp.ge.s32.totalorder %s33_s30, 2 }
  0x14   : > { %s498_s5 = scalar_lea.vmem %s150_s27, 16  ;;  %p506_p7 = scmp.lt.s32.totalorder %s150_s27, %s150_s27 }
  0x15   : > { %p723_p11 = pnand %p429_p10, %p691_p1  ;;  %p499_p13 = scmp.ne.s32.totalorder %s150_s27, %s498_s5 }
  0x16   : > { %p507_p6 = scmp.lt.s32.totalorder %s498_s5, %s498_s5 }
  0x17   : > { %p500_p0 = pneg %p723_p11 }
  0x18   : > { %p508_p9 = por %p507_p6, %p506_p7 }
  0x19   : > { %p501_p3 = pnand %p500_p0, %p499_p13 }
  0x1b   : > { %p502_p5 = pneg %p501_p3 }
  0x1d   : > { %p509_p4 = pnand %p508_p9, %p502_p5 }
  0x1f   : > { %512 = shalt.err (!%p509_p4)
}
  0x20   : > { %s631_s6 = smov [#allocation3]   ;;  %s887_s30 = smov (%p35_p12, %s33_s30), 0 }
  0x21   : > { %432 = dma.vmem_to_smem (!%p723_p11), %s150_s27, 16, %s631_s6, [#allocation6]  }
  0x22   : > { %p91_p10 = scmp.ne.s32.totalorder %s617_s16, %s613_s15  ;;  %p92_p6 = scmp.eq.s32.totalorder %s629_s19, 0 }
  0x23   : > { %s79_s7 = ssub.s32 %s625_s18, %s887_s30  ;;  %p442_p4 = scmp.lt.s32.totalorder %s629_s19, 2 }
  0x24   : > { %p82_p9 = scmp.eq.s32.totalorder %s79_s7, 0  ;;  %p93_p13 = por %p92_p6, %p91_p10 }
  0x25   : > { %p743_p0 = por %p695_p2, %p91_p10  ;;  %s163_s9 = sand.u32 1, %s617_s16  }
  0x26   : > { %s749_s10 = scalar_select %p82_p9, %s617_s16, %s84_s4  }
  0x27   : > { %s874_s8 = scalar_select %p743_p0, 1, 0 }
  0x28   : > { %s401_s11 = sshll.u32 %s163_s9, 3  ;;  %s419_s12 = sshll.u32 %s625_s18, 7 }
  0x29   : > { %s755_s20 = scalar_lea.hbm %s862_s2, %s419_s12  ;;  %s167_s25 = scalar_lea.vmem [#allocation7], %s401_s11 }
  0x2a   : > { %s177_s22 = sshll.u32 %s167_s25, 4  ;;  %p759_p2 = pnand %p442_p4, %p93_p13  ;;  %s757_s22 = int_to_ptr.vmem [resolvable:$true] %s177_s22 }
  0x2b   : > { %s164_s27 = scalar_lea.sflag [#allocation4], %s163_s9  ;;  %s513_s29 = scalar_lea.hbm %s755_s20, 128 }
  0x2c   : > { %p514_p11 = scmp.ne.s32.totalorder %s755_s20, %s513_s29  ;;  %p515_p12 = pneg %p759_p2 }
  0x2d   : > { %s518_s6 = scalar_lea.hbm %s862_s2, 256  ;;  %p519_p7 = scmp.lt.u32.totalorder %s755_s20, %s862_s2 }
  0x2e   : > { %p516_p3 = pnand %p515_p12, %p514_p11  ;;  %p520_p10 = scmp.lt.u32.totalorder %s518_s6, %s513_s29 }
  0x2f   : > { %p522_p4 = scmp.lt.u32.totalorder %s513_s29, %s755_s20 }
  0x30   : > { %p517_p5 = pneg %p516_p3  ;;  %p521_p6 = por %p520_p10, %p519_p7 }
  0x32   : > { %p523_p9 = por %p522_p4, %p521_p6 }
  0x34   : > { %p524_p13 = pnand %p523_p9, %p517_p5 }
  0x36   : > { %527 = shalt.err (!%p524_p13)
}
  0x37   : > { %s528_s9 = scalar_lea.vmem %s757_s22, 128  ;;  %s632_s12 = smov [#allocation7]  }
  0x38   : > { %p529_p11 = scmp.ne.s32.totalorder %s757_s22, %s528_s9  ;;  %s533_s13 = sshll.u32 %s632_s12, 4  ;;  %s534_s13 = int_to_ptr.vmem [resolvable:$false] %s533_s13 }
  0x39   : > { %s535_s1 = scalar_lea.vmem %s534_s13, 256  ;;  %p536_p1 = scmp.lt.s32.totalorder %s757_s22, %s534_s13 }
  0x3a   : > { %p531_p3 = pnand %p529_p11, %p515_p12  ;;  %p537_p7 = scmp.lt.s32.totalorder %s535_s1, %s528_s9 }
  0x3c   : > { %p532_p0 = pneg %p531_p3  ;;  %p538_p10 = por %p537_p7, %p536_p1 }
  0x3e   : > { %p539_p6 = pnand %p538_p10, %p532_p0 }
  0x40   : > { %542 = shalt.err (!%p539_p6)
}
  0x41   : > { %436 = dma.hbm_to_vmem [thread:$0]  (!%p759_p2), %s755_s20, 128, %s757_s22, %s164_s27  }
  0x42   : > { %186 = sbr.rel (%p714_p8) target bundleno = 148 (0x94), region = 32  ;;  %p876_p12 = scmp.ne.s32.totalorder (!%p714_p8), %s868_s21, 0 }
  0x49   : > { %596 = dma.done.wait (%p876_p12), [#allocation6], 16  }
  0x4a   : > { %598 = vsyncadd (%p876_p12), [#allocation6], 4294967280  ;;  %s795_s25 = sand.u32 1, %s613_s15   ;;  %p877_p1 = scmp.ne.s32.totalorder %s870_s23, 0 }
  0x4b   : > { %s406_s26 = sshll.u32 %s795_s25, 3  ;;  %s193_s29 = scalar_lea.sflag [#allocation4], %s795_s25 }
  0x4c   : > { %s196_s20 = scalar_lea.vmem [#allocation7], %s406_s26 }
  0x4d   : > { %600 = dma.done.wait (%p877_p1), %s193_s29, 128  }
  0x4e   : > { %602 = vsyncadd (%p877_p1), %s193_s29, 4294967168 }
  0x4f   : > { %201 = sfence }
  0x50   : > { %s223_s28 = sld [smem:[#allocation2]]  ;;  %s408_s22 = sld [smem:[#allocation3 + $0x1]]  ;;  %v222_v0 = vld [vmem:[%s196_s20] sm:$0xff]  ;;  %v259_v21 = vlaneseq }
  0x51   : > { %s225_s21 = sld [smem:[#allocation3]]  ;;  %s410_s27 = sld [smem:[#allocation3 + $0x2]] }
  0x52   : > { %s412_s4 = sld [smem:[#allocation3 + $0x3]]  ;;  %v260_v22 = vshrl.u32 %v259_v21, 7  ;;  %s219_s23 = scalar_lea.vmem [#allocation8], %s406_s26 }
  0x53   : > { %s300_s5 = sshll.u32 %s219_s23, 4  ;;  %s420_s6 = sshll.u32 %s621_s17, 7  ;;  %s808_s5 = int_to_ptr.vmem [resolvable:$true] %s300_s5 }
  0x54   : > { %v261_v23 = vsub.s32 0, %v260_v22  ;;  %v265_v24 = vsub.s32 4, %v260_v22  ;;  %s813_s9 = scalar_lea.hbm %s863_s3, %s420_s6  ;;  %s284_s12 = scalar_lea.sflag [#allocation5], %s795_s25 }
  0x55   : > { %s543_s13 = scalar_lea.vmem %s808_s5, 128  ;;  %p878_p0 = scmp.ne.s32.totalorder %s874_s8, 0 }
  0x56   : > { %v224_v1 = vstv %s223_s28  ;;  %v230_v3 = vstv %s408_s22  ;;  %p544_p8 = scmp.ne.s32.totalorder %s808_s5, %s543_s13  ;;  %s633_s17 = smov [#allocation8]  }
  0x57   : > { %v226_v2 = vstv %s225_s21  ;;  %v231_v5 = vmul.f32 %v230_v3, %v222_v0  ;;  %v238_v6 = vstv %s410_s27  ;;  %s547_s1 = sshll.u32 %s633_s17, 4  ;;  %s548_s1 = int_to_ptr.vmem [resolvable:$false] %s547_s1 }
  0x58   : > { %v227_v4 = vmul.f32 %v226_v2, %v222_v0  ;;  %v246_v7 = vstv %s412_s4  ;;  %v239_v8 = vmul.f32 %v238_v6, %v222_v0  ;;  %p545_p2 = pnand %p544_p8, %p878_p0  ;;  %s549_s26 = scalar_lea.vmem %s548_s1, 256 }
  0x59   : > { %v247_v9 = vmul.f32 %v246_v7, %v222_v0  ;;  %v409_v11 = vrot.slane %v231_v5, 9  ;;  %p550_p4 = scmp.lt.s32.totalorder %s808_s5, %s548_s1  ;;  %p551_p9 = scmp.lt.s32.totalorder %s549_s26, %s543_s13 }
  0x5a   : > { %v228_v10 = vadd.f32 %v227_v4, %v224_v1  ;;  %v411_v12 = vrot.slane %v239_v8, 10  ;;  %p546_p5 = pneg %p545_p2 }
  0x5b   : > { %v413_v14 = vrot.slane %v247_v9, 11  ;;  %p552_p13 = por %p551_p9, %p550_p4 }
  0x5c   : > { %v236_v13 = vadd.f32 %v409_v11, %v228_v10 }
  0x5d   : > { %p553_p11 = pnand %p552_p13, %p546_p5 }
  0x5e   : > { %v244_v15 = vadd.f32 %v411_v12, %v236_v13 }
  0x60   : > { %v252_v16 = vadd.f32 %v413_v14, %v244_v15 }
  0x62   : > { %v253_v17 = vsub.f32 0.0, %v252_v16 }
  0x64   : > { %v254_v18 = vmul.f32 1.442695, %v253_v17 }
  0x66   : > { %494 = vpow2.f32 %v254_v18 }
  0x70   : > { %v495_v19 = vpop.eup %494 }
  0x71   : > { %v256_v20 = vadd.f32 1.0, %v495_v19 }
  0x73   : > { %496 = vrcp.f32 %v256_v20 }
  0x7d   : > { %v497_v25 = vpop.eup %496 }
  0x7e   : > { %v262_v26 = vrot.slane %v497_v25, %v261_v23  ;;  %v266_v27 = vrot.slane %v497_v25, %v265_v24 }
  0x80   : > { %v272_v28 = vrot.slane %v262_v26, %v261_v23  ;;  %v276_v29 = vrot.slane %v266_v27, %v261_v23 }
  0x82   : > { %v279_v30 = vcombine.low %v272_v28, %v276_v29 }
  0x84   : > { %v281_v31 = vmul.f32 %v279_v30, %v222_v0 }
  0x86   : > { %282 = vst [vmem:[%s219_s23] sm:$0xff] %v281_v31 }
  0x87   : > { %556 = shalt.err (!%p553_p11)
}
  0x88   : > { %s557_s25 = scalar_lea.hbm %s813_s9, 128  ;;  %s561_s28 = scalar_lea.hbm %s863_s3, 256 }
  0x89   : > { %p558_p3 = scmp.ne.s32.totalorder %s813_s9, %s557_s25  ;;  %p562_p6 = scmp.lt.u32.totalorder %s813_s9, %s863_s3 }
  0x8a   : > { %p563_p12 = scmp.lt.u32.totalorder %s561_s28, %s557_s25  ;;  %p565_p8 = scmp.lt.u32.totalorder %s557_s25, %s813_s9 }
  0x8b   : > { %p559_p7 = pnand %p558_p3, %p878_p0 }
  0x8c   : > { %p564_p1 = por %p563_p12, %p562_p6 }
  0x8d   : > { %p560_p10 = pneg %p559_p7 }
  0x8e   : > { %p566_p2 = por %p565_p8, %p564_p1 }
  0x90   : > { %p567_p5 = pnand %p566_p2, %p560_p10 }
  0x92   : > { %570 = shalt.err (!%p567_p5)
}
  0x93   : > { %427 = dma.vmem_to_hbm [thread:$0]  (%p878_p0), %s808_s5, 128, %s813_s9, %s284_s12  }
  0x94 PF: > { %s312_s27 = sand.u32 1, %s609_s14   ;;  %p879_p4 = scmp.ne.s32.totalorder %s871_s24, 0 }
  0x95   : > { %p880_p9 = scmp.ge.s32.totalorder %s629_s19, 2  ;;  %s313_s4 = scalar_lea.sflag [#allocation5], %s312_s27 }
  0x97   : > { %p438_p13 = pnand %p880_p9, %p879_p4 }
  0x99   : > { %604 = dma.done.wait (!%p438_p13), %s313_s4, 128  }
  0x9a   : > { %606 = vsyncadd (!%p438_p13), %s313_s4, 4294967168  ;;  %s21_s19 = sadd.s32 1, %s629_s19   ;;  %s881_s14 = smov %s613_s15 }
  0x9b   : > { %p18_p11 = scmp.ge.s32.totalorder %s21_s19, 4   ;;  %s882_s15 = smov %s617_s16 }
  0x9c   : > { %s883_s16 = smov %s749_s10  ;;  %s884_s17 = smov %s625_s18 }
  0x9d   : > { %s885_s18 = smov %s887_s30  ;;  %20 = sbr.rel (!%p18_p11) target bundleno = 9 (0x9), region = 82 }
  0xa4   :  { %318 = vsyncpa [#allocation4], 1 }
  0xa5   :  { %320 = vsyncpa [#allocation4 + $0x1], 1 }
  0xa6   :  { %321 = vsyncpa [#allocation5], 1 }
  0xa7   :  { %323 = vsyncpa [#allocation5 + $0x1], 1 }
  0xa8   :  { %324 = vsyncpa [#allocation6], 1 }
  0xa9   :  { %326 = vsyncpa [#allocation6 + $0x1], 1 }

</bundles_post_ra>
